<compile_context>
chip_gen: v7x
topology: tpu7x:2x2x1
jax: 0.10.0
libtpu: 0.0.40
codegen_flags: <defaults>
</compile_context>

<pallas_src>
import jax
import jax.numpy as jnp
from jax.experimental import pallas as pl
from jax.experimental.pallas import tpu as pltpu

# ----------------------------- configuration -------------------------------
N_IN = 4              # n_inputs
N_OUT = 8             # n_outputs
K = 3                 # kernel_size
STRIDE = 1            # stride (TCN always uses 1)
DIL = 2               # dilation
PAD = (K - 1) * DIL   # causal padding
L = 16                # sequence length
N = 2                 # batch
LP = L + PAD          # left-padded length
NL = N * L            # batch-major fused time axis (lanes)


# ------------------------------- kernel ------------------------------------
def temporal_block_kernel(x1_ref, w1_ref, b1_ref, w2_ref, b2_ref,
                          xres_ref, wd_ref, bd_ref, out_ref):
    """Whole batch in one invocation; lanes hold the (batch-major) time axis.

    x1_ref  : (K*N_IN, NL)    im2col of the left-padded input (row = j*N_IN+c)
    w1_ref  : (N_OUT, K*N_IN) folded weight-norm conv1 weight
    b1_ref  : (N_OUT, 1)
    w2_ref  : (N_OUT, K*N_OUT)
    b2_ref  : (N_OUT, 1)
    xres_ref: (N_IN, NL)      unpadded input for the 1x1 residual conv
    wd_ref  : (N_OUT, N_IN)
    bd_ref  : (N_OUT, 1)
    out_ref : (N_OUT, NL)
    """
    # ---- conv1 as a single fused MXU matmul (+bias, ReLU; dropout = id) ----
    h1 = jnp.maximum(
        jnp.dot(w1_ref[...], x1_ref[...],
                preferred_element_type=jnp.float32) + b1_ref[...], 0.0)

    # ---- build conv2 im2col from h1 in registers (no VMEM scratch) ---------
    # Tap j needs h1 shifted right by s = PAD - j*DIL within each length-L
    # batch segment, zero-filling the first s positions of every segment.
    lane_t = jax.lax.broadcasted_iota(jnp.int32, (N_OUT, NL), 1) % L
    taps = []
    for j in range(K):
        s = PAD - j * DIL
        if s == 0:
            taps.append(h1)
        else:
            shifted = jnp.concatenate(
                [jnp.zeros((N_OUT, s), jnp.float32), h1[:, :NL - s]], axis=1)
            taps.append(jnp.where(lane_t >= s, shifted, 0.0))
    h1_cols = jnp.concatenate(taps, axis=0)              # (K*N_OUT, NL)

    # ---- conv2 (single matmul) + ReLU --------------------------------------
    h2 = jnp.maximum(
        jnp.dot(w2_ref[...], h1_cols,
                preferred_element_type=jnp.float32) + b2_ref[...], 0.0)

    # ---- residual 1x1 downsample conv + final ReLU --------------------------
    res = jnp.dot(wd_ref[...], xres_ref[...],
                  preferred_element_type=jnp.float32) + bd_ref[...]
    out_ref[...] = jnp.maximum(h2 + res, 0.0).astype(out_ref.dtype)


# ------------------------------- wrapper ------------------------------------
def temporal_block(x, w1, b1, w2, b2, wd, bd):
    """x: (N, N_IN, L) float32 -> (N, N_OUT, L) float32."""
    xpad = jnp.pad(x, ((0, 0), (0, 0), (PAD, 0)))        # causal left pad

    # im2col for conv1: row = j*N_IN + c, col = n*L + t
    x1 = jnp.concatenate(
        [xpad[:, :, j * DIL: j * DIL + L] for j in range(K)], axis=1)
    x1 = x1.transpose(1, 0, 2).reshape(K * N_IN, NL)

    # lane-aligned unpadded input for the residual path
    xres = x.transpose(1, 0, 2).reshape(N_IN, NL)

    # fold the K taps into the weight's contraction axis (row = j*C_in + c)
    w1_2d = jnp.transpose(w1, (0, 2, 1)).reshape(N_OUT, K * N_IN)
    w2_2d = jnp.transpose(w2, (0, 2, 1)).reshape(N_OUT, K * N_OUT)
    b1c = b1.reshape(N_OUT, 1)
    b2c = b2.reshape(N_OUT, 1)
    bdc = bd.reshape(N_OUT, 1)

    vmem = pl.BlockSpec(memory_space=pltpu.MemorySpace.VMEM)
    out2d = pl.pallas_call(
        temporal_block_kernel,
        out_shape=jax.ShapeDtypeStruct((N_OUT, NL), jnp.float32),
        in_specs=[vmem] * 8,
        out_specs=vmem,
    )(x1, w1_2d, b1c, w2_2d, b2c, xres, wd, bdc)

    # (N_OUT, N*L) -> (N, N_OUT, L)
    return out2d.reshape(N_OUT, N, L).transpose(1, 0, 2)


# --------------------------- parameter setup --------------------------------
def weight_norm_effective(v, g):
    """PyTorch weight_norm (dim=0): w[o] = g[o] * v[o] / ||v[o]||_2."""
    norm = jnp.sqrt(jnp.sum(v * v, axis=(1, 2), keepdims=True))
    return g[:, None, None] * v / norm


def make_params(key):
    k1, k2, k3, k4, k5, k6 = jax.random.split(key, 6)
    # conv weights ~ N(0, 0.01) as in init_weights(); weight_norm init g=||v||
    v1 = 0.01 * jax.random.normal(k1, (N_OUT, N_IN, K), jnp.float32)
    g1 = jnp.sqrt(jnp.sum(v1 * v1, axis=(1, 2)))
    w1 = weight_norm_effective(v1, g1)
    v2 = 0.01 * jax.random.normal(k2, (N_OUT, N_OUT, K), jnp.float32)
    g2 = jnp.sqrt(jnp.sum(v2 * v2, axis=(1, 2)))
    w2 = weight_norm_effective(v2, g2)
    wd = 0.01 * jax.random.normal(k3, (N_OUT, N_IN), jnp.float32)
    b1 = 0.1 * jax.random.normal(k4, (N_OUT,), jnp.float32)
    b2 = 0.1 * jax.random.normal(k5, (N_OUT,), jnp.float32)
    bd = 0.1 * jax.random.normal(k6, (N_OUT,), jnp.float32)
    return w1, b1, w2, b2, wd, bd


# --------------------------- pure-JAX reference ------------------------------
def ref_forward(x, w1, b1, w2, b2, wd, bd):
    def causal_conv(h, w, b):
        hp = jnp.pad(h, ((0, 0), (0, 0), (PAD, 0)))
        o = jax.lax.conv_general_dilated(
            hp, w, window_strides=(STRIDE,), padding="VALID",
            rhs_dilation=(DIL,), dimension_numbers=("NCH", "OIH", "NCH"))
        return o + b[None, :, None]

    h1 = jnp.maximum(causal_conv(x, w1, b1), 0.0)
    h2 = jnp.maximum(causal_conv(h1, w2, b2), 0.0)
    res = jnp.einsum("oc,ncl->nol", wd, x) + bd[None, :, None]
    return jnp.maximum(h2 + res, 0.0)


# --------------------------------- main --------------------------------------
if __name__ == "__main__":
    key = jax.random.PRNGKey(0)
    kx, kp = jax.random.split(key)
    x = jax.random.normal(kx, (N, N_IN, L), jnp.float32)
    params = make_params(kp)

    out = temporal_block(x, *params)
    out = jax.block_until_ready(out)

    ref = ref_forward(x, *params)
    assert out.shape == (N, N_OUT, L)
    assert jnp.allclose(out, ref, atol=1e-5, rtol=1e-5), (
        f"max abs err {jnp.max(jnp.abs(out - ref))}")
    print("KERNEL_OK")
</pallas_src>

<mosaic_0001>
module attributes {stable_mosaic.version = 11 : i64} {
  func.func @temporal_block_kernel(%arg0: memref<12x32xf32, #tpu.memory_space<vmem>>, %arg1: memref<8x12xf32, #tpu.memory_space<vmem>>, %arg2: memref<8x1xf32, #tpu.memory_space<vmem>>, %arg3: memref<8x24xf32, #tpu.memory_space<vmem>>, %arg4: memref<8x1xf32, #tpu.memory_space<vmem>>, %arg5: memref<4x32xf32, #tpu.memory_space<vmem>>, %arg6: memref<8x4xf32, #tpu.memory_space<vmem>>, %arg7: memref<8x1xf32, #tpu.memory_space<vmem>>, %arg8: memref<8x32xf32, #tpu.memory_space<vmem>>) attributes {dimension_semantics = [], scalar_prefetch = 0 : i64, scratch_operands = 0 : i64, tpu.core_type = #tpu.core_type<tc>} {
    %c0 = arith.constant 0 : index
    %c0_0 = arith.constant 0 : index
    %0 = vector.load %arg1[%c0, %c0_0] : memref<8x12xf32, #tpu.memory_space<vmem>>, vector<8x12xf32>
    %c0_1 = arith.constant 0 : index
    %c0_2 = arith.constant 0 : index
    %1 = vector.load %arg0[%c0_1, %c0_2] : memref<12x32xf32, #tpu.memory_space<vmem>>, vector<12x32xf32>
    %cst = arith.constant dense<0.000000e+00> : vector<8x32xf32>
    %2 = tpu.matmul %0, %1, %cst {dimension_numbers = #tpu.dot_dimension_numbers<[1], [0], [0], [1], [0, 0, 1, 1], [], []>} : vector<8x12xf32>, vector<12x32xf32>, vector<8x32xf32> -> vector<8x32xf32>
    %c0_3 = arith.constant 0 : index
    %c0_4 = arith.constant 0 : index
    %3 = vector.load %arg2[%c0_3, %c0_4] : memref<8x1xf32, #tpu.memory_space<vmem>>, vector<8x1xf32>
    %4 = vector.broadcast %3 : vector<8x1xf32> to vector<8x32xf32>
    %5 = arith.addf %2, %4 : vector<8x32xf32>
    %cst_5 = arith.constant 0.000000e+00 : f32
    %6 = vector.broadcast %cst_5 : f32 to vector<8x32xf32>
    %7 = arith.maximumf %5, %6 : vector<8x32xf32>
    %8 = tpu.iota {dimensions = array<i32: 1>} : vector<8x32xi32>
    %c16_i32 = arith.constant 16 : i32
    %c0_i32 = arith.constant 0 : i32
    %9 = arith.cmpi eq, %c16_i32, %c0_i32 : i32
    %c1_i32 = arith.constant 1 : i32
    %10 = arith.select %9, %c1_i32, %c16_i32 : i32
    %11 = vector.broadcast %10 : i32 to vector<8x32xi32>
    %12 = arith.remsi %8, %11 : vector<8x32xi32>
    %c0_i32_6 = arith.constant 0 : i32
    %13 = vector.broadcast %c0_i32_6 : i32 to vector<8x32xi32>
    %14 = arith.cmpi ne, %12, %13 : vector<8x32xi32>
    %c0_i32_7 = arith.constant 0 : i32
    %15 = vector.broadcast %c0_i32_7 : i32 to vector<8x32xi32>
    %16 = arith.cmpi slt, %12, %15 : vector<8x32xi32>
    %c0_i32_8 = arith.constant 0 : i32
    %17 = arith.cmpi slt, %10, %c0_i32_8 : i32
    %18 = vector.broadcast %17 : i1 to vector<8x32xi1>
    %19 = vector.broadcast %18 : vector<8x32xi1> to vector<8x32xi1>
    %20 = arith.xori %16, %19 : vector<8x32xi1>
    %21 = arith.andi %20, %14 : vector<8x32xi1>
    %22 = vector.broadcast %10 : i32 to vector<8x32xi32>
    %23 = arith.addi %12, %22 : vector<8x32xi32>
    %24 = arith.select %21, %23, %12 : vector<8x32xi1>, vector<8x32xi32>
    %cst_9 = arith.constant 0.000000e+00 : f32
    %25 = vector.broadcast %cst_9 : f32 to vector<8x4xf32>
    %26 = vector.extract_strided_slice %7 {offsets = [0, 0], sizes = [8, 28], strides = [1, 1]} : vector<8x32xf32> to vector<8x28xf32>
    %27 = tpu.concatenate %25, %26 in 1 : vector<8x4xf32>, vector<8x28xf32> -> vector<8x32xf32>
    %c4_i32 = arith.constant 4 : i32
    %28 = vector.broadcast %c4_i32 : i32 to vector<8x32xi32>
    %29 = arith.cmpi sge, %24, %28 : vector<8x32xi32>
    %cst_10 = arith.constant 0.000000e+00 : f32
    %30 = vector.broadcast %cst_10 : f32 to vector<8x32xf32>
    %31 = arith.select %29, %27, %30 : vector<8x32xi1>, vector<8x32xf32>
    %cst_11 = arith.constant 0.000000e+00 : f32
    %32 = vector.broadcast %cst_11 : f32 to vector<8x2xf32>
    %33 = vector.extract_strided_slice %7 {offsets = [0, 0], sizes = [8, 30], strides = [1, 1]} : vector<8x32xf32> to vector<8x30xf32>
    %34 = tpu.concatenate %32, %33 in 1 : vector<8x2xf32>, vector<8x30xf32> -> vector<8x32xf32>
    %c2_i32 = arith.constant 2 : i32
    %35 = vector.broadcast %c2_i32 : i32 to vector<8x32xi32>
    %36 = arith.cmpi sge, %24, %35 : vector<8x32xi32>
    %cst_12 = arith.constant 0.000000e+00 : f32
    %37 = vector.broadcast %cst_12 : f32 to vector<8x32xf32>
    %38 = arith.select %36, %34, %37 : vector<8x32xi1>, vector<8x32xf32>
    %39 = tpu.concatenate %31, %38, %7 in 0 : vector<8x32xf32>, vector<8x32xf32>, vector<8x32xf32> -> vector<24x32xf32>
    %c0_13 = arith.constant 0 : index
    %c0_14 = arith.constant 0 : index
    %40 = vector.load %arg3[%c0_13, %c0_14] : memref<8x24xf32, #tpu.memory_space<vmem>>, vector<8x24xf32>
    %cst_15 = arith.constant dense<0.000000e+00> : vector<8x32xf32>
    %41 = tpu.matmul %40, %39, %cst_15 {dimension_numbers = #tpu.dot_dimension_numbers<[1], [0], [0], [1], [0, 0, 1, 1], [], []>} : vector<8x24xf32>, vector<24x32xf32>, vector<8x32xf32> -> vector<8x32xf32>
    %c0_16 = arith.constant 0 : index
    %c0_17 = arith.constant 0 : index
    %42 = vector.load %arg4[%c0_16, %c0_17] : memref<8x1xf32, #tpu.memory_space<vmem>>, vector<8x1xf32>
    %43 = vector.broadcast %42 : vector<8x1xf32> to vector<8x32xf32>
    %44 = arith.addf %41, %43 : vector<8x32xf32>
    %cst_18 = arith.constant 0.000000e+00 : f32
    %45 = vector.broadcast %cst_18 : f32 to vector<8x32xf32>
    %46 = arith.maximumf %44, %45 : vector<8x32xf32>
    %c0_19 = arith.constant 0 : index
    %c0_20 = arith.constant 0 : index
    %47 = vector.load %arg6[%c0_19, %c0_20] : memref<8x4xf32, #tpu.memory_space<vmem>>, vector<8x4xf32>
    %c0_21 = arith.constant 0 : index
    %c0_22 = arith.constant 0 : index
    %48 = vector.load %arg5[%c0_21, %c0_22] : memref<4x32xf32, #tpu.memory_space<vmem>>, vector<4x32xf32>
    %cst_23 = arith.constant dense<0.000000e+00> : vector<8x32xf32>
    %49 = tpu.matmul %47, %48, %cst_23 {dimension_numbers = #tpu.dot_dimension_numbers<[1], [0], [0], [1], [0, 0, 1, 1], [], []>} : vector<8x4xf32>, vector<4x32xf32>, vector<8x32xf32> -> vector<8x32xf32>
    %c0_24 = arith.constant 0 : index
    %c0_25 = arith.constant 0 : index
    %50 = vector.load %arg7[%c0_24, %c0_25] : memref<8x1xf32, #tpu.memory_space<vmem>>, vector<8x1xf32>
    %51 = vector.broadcast %50 : vector<8x1xf32> to vector<8x32xf32>
    %52 = arith.addf %49, %51 : vector<8x32xf32>
    %53 = arith.addf %46, %52 : vector<8x32xf32>
    %cst_26 = arith.constant 0.000000e+00 : f32
    %54 = vector.broadcast %cst_26 : f32 to vector<8x32xf32>
    %55 = arith.maximumf %53, %54 : vector<8x32xf32>
    %c0_27 = arith.constant 0 : index
    %c0_28 = arith.constant 0 : index
    %56 = vector.load %arg8[%c0_27, %c0_28] : memref<8x32xf32, #tpu.memory_space<vmem>>, vector<8x32xf32>
    tpu.vector_store %arg8[%c0_27, %c0_28], %55 {strides = array<i32>} : memref<8x32xf32, #tpu.memory_space<vmem>>, vector<8x32xf32>,
    return
  }
}

</mosaic_0001>

<bundles_post_ra>
// kernel: tpu_custom_call.1
= control target key start
LH: loop header
LB: loop body
LE: loop exit
PB: predicated region body
PF: predicated region fallthrough
CT: control target
= control target key end

     0   :  { %vm43_vm0 = vcmask 1043456   ;;  %v410_v2 = vmov 0.0|0.0   ;;  %vm411_vm1 = vmmov 1   ;;  %vm412_vm3 = vmmov 0   ;;  %s509_s0 = inlined_call_operand.vmem [shape: f32[12,32], index: 0, kind: input, shape index: {}]   ;;  %s510_s1 = inlined_call_operand.vmem [shape: f32[8,12], index: 1, kind: input, shape index: {}]   ;;  %s511_s2 = inlined_call_operand.vmem [shape: f32[8,1], index: 2, kind: input, shape index: {}]   ;;  %s512_s3 = inlined_call_operand.vmem [shape: f32[8,24], index: 3, kind: input, shape index: {}]   ;;  %s513_s4 = inlined_call_operand.vmem [shape: f32[8,1], index: 4, kind: input, shape index: {}]   ;;  %s514_s5 = inlined_call_operand.vmem [shape: f32[4,32], index: 5, kind: input, shape index: {}]   ;;  %s515_s6 = inlined_call_operand.vmem [shape: f32[8,4], index: 6, kind: input, shape index: {}]   ;;  %s516_s7 = inlined_call_operand.vmem [shape: f32[8,1], index: 7, kind: input, shape index: {}]   ;;  %s517_s8 = inlined_call_operand.hbm [shape: f32[8,32], index: 8, kind: output, shape index: {}]  }
   0x1   :  { %v31_v0 = vld [vmem:[%s509_s0] sm:$0xff]  ;;  %v32_v1 = vld [vmem:[%s509_s0 + $0x8] sm:$0xf]  ;;  %368 = vmatprep.subr.bf16.mxu0 %v410_v2  ;;  %vm370_vm2 = vmpackc.low %vm43_vm0, %vm411_vm1  ;;  %372 = vmatprep.subr.bf16.mxu1 %v410_v2  ;;  %v413_v5 = vmov 0.0   ;;  %vm39_vm4 = vcmask 97280   ;;  %v414_v7 = vmov 0  }
   0x2   :  { %v369_v3 = vpack.c.bf16 %v32_v1, %v31_v0  ;;  %v33_v4 = vld [vmem:[%s511_s2] sm:$0xff]  ;;  %351 = vmatprep.mubr.msk.f32.mxu0 %vm412_vm3, %v413_v5  ;;  %360 = vmatprep.mubr.msk.f32.mxu1 %vm412_vm3, %v413_v5 }
   0x3   :  { %v30_v6 = vld [vmem:[%s510_s1] sm:$0xff]  ;;  %384 = vset.pattern.permute.xlu0 %v414_v7 }
   0x4   :  { %371 = vmatpush3.bf16.msk.msra.mxu0 %vm370_vm2, %v369_v3 }
   0x5   :  { %13 = vsyncpa [#allocation3], 0  ;;  %36 = vperm.xlu0 %384, %v33_v4   ;;  %363 = vmatprep.subr.mxu0 %v413_v5  ;;  %v230_v8 = vld [vmem:[%s514_s5] sm:$0xf]  ;;  %vm136_vm5 = vcmask 31744   ;;  %s415_s1 = smov 2   ;;  %v118_v19 = vlaneseq }
   0x6   :  { %385 = vset.pattern.permute.xlu1 %v414_v7  ;;  %v229_v9 = vld [vmem:[%s515_s6] sm:$0xff]  ;;  %s416_s5 = smov 4   ;;  %vm143_vm6 = vcmask 15360   ;;  %vm154_vm10 = vcmask 195584   ;;  %vm315_vm11 = vcmask 261120  }
   0x7   :  { %352 = vmatmul.mubr.msk.f32.vlgmr.msra.gmra.mrb[0].mxu0 %vm39_vm4, %v30_v6  ;;  %v231_v15 = vld [vmem:[%s516_s7] sm:$0xff]  ;;  %v119_v20 = vand.u32 127, %v118_v19 }
   0x8   :  { %364 = vmatpush3.msk.msra.mxu0 %vm43_vm0, %v230_v8  ;;  %365 = vmatprep.mubr.msk.f32.mxu0 %vm412_vm3, %v413_v5  ;;  %v148_v17 = vld [vmem:[%s513_s4] sm:$0xff]  ;;  %s417_s4 = smov [#allocation2]  }
   0x9   :  { %v124_v21 = vand.u32 15, %v119_v20  ;;  %v147_v27 = vld [vmem:[%s512_s3] sm:$0xff]  ;;  %s323_s19 = sshll.u32 %s417_s4, 4  ;;  %s324_s19 = int_to_ptr.vmem [resolvable:$true] %s323_s19 }
   0xa   :  { %s386_s20 = scalar_lea.vmem %s324_s19, 128  ;;  %p391_p1 = scmp.lt.s32.totalorder %s324_s19, %s324_s19 }
   0xb   :  { %366 = vmatmul.mubr.msk.f32.vlgmr.msra.gmra.mrb[2].mxu0 %vm136_vm5, %v229_v9  ;;  %vm138_vm7 = vcmp.ge.s32.totalorder %v124_v21, 4  ;;  %vm145_vm8 = vcmp.ge.s32.totalorder %v124_v21, 2  ;;  %p387_p0 = scmp.ne.s32.totalorder %s324_s19, %s386_s20  ;;  %p392_p2 = scmp.lt.s32.totalorder %s386_s20, %s386_s20 }
   0xc   :  { %vm374_vm9 = vmpackc.low %vm145_vm8, %vm138_vm7 }
   0xd   :  { %p393_p3 = por %p392_p2, %p391_p1 }
   0xf   :  { %p394_p4 = pnand %p393_p3, %p387_p0 }
  0x84   :  { %v37_v10 = vpop.permute.xlu0 %36 }
  0xda   :  { %v113_v11 = vpop.f32.mrb[0].mxu0 }
  0xdb   :  { %v114_v12 = vadd.f32 %v113_v11, %v37_v10  ;;  %v353_v13 = vpop.f32.mrb[1].mxu0 }
  0xdd   :  { %v117_v14 = vmax.f32 %v114_v12, 0.0 }
  0xde   :  { %v309_v16 = vpop.f32.mrb[2].mxu0 }
  0xdf   :  { %140 = vrot.lane.b32.xlu1 %v117_v14, %s415_s1  ;;  %133 = vrot.lane.b32.xlu0 %v117_v14, %s416_s5  ;;  %v367_v18 = vpop.f32.mrb[3].mxu0 }
  0xe3   :  { %234 = vperm.xlu0 %384, %v231_v15   ;;  %151 = vperm.xlu1 %385, %v148_v17  }
 0x151   :  { %v141_v22 = vpop.permute.xlu1 %140  ;;  %v134_v23 = vpop.permute.xlu0 %133 }
 0x152   :  { %v144_v24 = vsel %vm143_vm6, 0.0, %v141_v22  ;;  %v137_v25 = vsel %vm136_vm5, 0.0, %v134_v23 }
 0x153   :  { %v373_v26 = vpack.c.bf16 %v144_v24, %v137_v25 }
 0x155   :  { %375 = vmatpush3.bf16.msk.msra.mxu1 %vm374_vm9, %v373_v26 }
 0x156   :  { %358 = vmatprep.subr.mxu1 %v413_v5 }
 0x159   :  { %359 = vmatpush3.msra.mxu1 %v117_v14 }
 0x15a   :  { %361 = vmatmul.mubr.msk.f32.vlgmr.msra.gmra.mrb[0].mxu1 %vm154_vm10, %v147_v27 }
 0x162   :  { %v152_v28 = vpop.permute.xlu1 %151  ;;  %v235_v29 = vpop.permute.xlu0 %234 }
 0x163   :  { %v310_v33 = vadd.f32 %v309_v16, %v235_v29 }
 0x22d   :  { %v224_v30 = vpop.f32.mrb[0].mxu1 }
 0x22e   :  { %v225_v31 = vadd.f32 %v224_v30, %v152_v28  ;;  %v362_v32 = vpop.f32.mrb[1].mxu1 }
 0x230   :  { %v228_v34 = vmax.f32 %v225_v31, 0.0 }
 0x232   :  { %v313_v35 = vadd.f32 %v310_v33, %v228_v34 }
 0x234   :  { %v314_v36 = vmax.f32 %v313_v35, 0.0 }
 0x236   :  { %316 = vst.msk [vmem:[#allocation2] sm:$0xff] %vm315_vm11, %v314_v36 }
 0x237   :  { %397 = shalt.err (!%p394_p4)
}
 0x238   :  { %s398_s22 = scalar_lea.hbm %s517_s8, 128 }
 0x239   :  { %p399_p5 = scmp.ne.s32.totalorder %s517_s8, %s398_s22  ;;  %p402_p6 = scmp.lt.u32.totalorder %s398_s22, %s517_s8 }
 0x23b   :  { %p404_p7 = pnand %p402_p6, %p399_p5 }
 0x23d   :  { %407 = shalt.err (!%p404_p7)
}
 0x23e   :  { %326 = dma.vmem_to_hbm [thread:$0]  %s324_s19, 128, %s517_s8, [#allocation3]  }
 0x23f   :  { %408 = dma.done.wait [#allocation3], 128  }
 0x240   :  { %409 = vsyncadd [#allocation3], 4294967168 }
 0x241   :  { %330 = vsyncpa [#allocation3], 1 }

</bundles_post_ra>
